<compile_context>
chip_gen: v6e
topology: v6e:2x2x1
jax: 0.10.0
libtpu: 0.0.40
codegen_flags: <defaults>
</compile_context>

<pallas_src>
import jax
import jax.numpy as jnp
import numpy as np
from jax.experimental import pallas as pl
from jax.experimental.pallas import tpu as pltpu

HIDDEN = 256


def actor_kernel(x_ref, w1_ref, b1_ref, w2_ref, b2_ref, w3_ref, b3_ref, out_ref):
    # fc1 + ReLU  (bf16 operands on the MXU, f32 accumulation; x pre-cast on host)
    h = jnp.dot(x_ref[...], w1_ref[...],
                preferred_element_type=jnp.float32) + b1_ref[...]
    h = jnp.maximum(h, 0.0)
    # fc2_2(fc2(.)) folded into a single matmul (no activation between them)
    h = jnp.dot(h.astype(jnp.bfloat16), w2_ref[...],
                preferred_element_type=jnp.float32) + b2_ref[...]
    h = jnp.maximum(h, 0.0)
    # fc3 + tanh, written to an unpadded (tb, out_size) block
    a = jnp.dot(h.astype(jnp.bfloat16), w3_ref[...],
                preferred_element_type=jnp.float32) + b3_ref[...]
    out_ref[...] = jnp.tanh(a).astype(out_ref.dtype)


def init_actor_params(key, input_size, output_size):
    """Deterministic f32 params reproducing the PyTorch module's init scheme.

    fanin_init: normal(0, 1/sqrt(size[0])) where size[0] == out_features (as in
    the reference code).  fc3 weight: normal(0, 0.003).  Biases keep nn.Linear's
    default uniform(-1/sqrt(fan_in), 1/sqrt(fan_in)) since init_weights() does
    not touch them.  Weights are stored transposed as (in_features, out_features).
    """
    ks = jax.random.split(key, 8)

    def fanin_w(k, out_f, in_f):
        std = 1.0 / np.sqrt(out_f)  # fanin_init quirk: fanin == out_features
        w = jax.random.normal(k, (out_f, in_f), jnp.float32) * std
        return w.T

    def default_b(k, out_f, in_f):
        bound = 1.0 / np.sqrt(in_f)
        return jax.random.uniform(k, (1, out_f), jnp.float32, -bound, bound)

    return {
        "w1_t": fanin_w(ks[0], HIDDEN, input_size),
        "b1": default_b(ks[1], HIDDEN, input_size),
        "w2_t": fanin_w(ks[2], HIDDEN, HIDDEN),
        "b2": default_b(ks[3], HIDDEN, HIDDEN),
        "w22_t": fanin_w(ks[4], HIDDEN, HIDDEN),
        "b22": default_b(ks[5], HIDDEN, HIDDEN),
        "w3_t": (jax.random.normal(ks[6], (output_size, HIDDEN), jnp.float32) * 0.003).T,
        "b3": default_b(ks[7], output_size, HIDDEN),
    }


def prepare_kernel_params(raw):
    """One-time host-side preprocessing:
      * fold fc2 / fc2_2:  W2' = W2ᵀ @ W22ᵀ ,  b2' = b2 @ W22ᵀ + b22  (exact algebra,
        no activation between fc2 and fc2_2 in the reference module)
      * cast weights to bf16 (biases / accumulation stay f32)
      * NO output-lane padding (unpadded writeback per perf review)
    """
    w2f = raw["w2_t"] @ raw["w22_t"]
    b2f = raw["b2"] @ raw["w22_t"] + raw["b22"]
    return {
        "w1": raw["w1_t"].astype(jnp.bfloat16), "b1": raw["b1"],
        "w2": w2f.astype(jnp.bfloat16),         "b2": b2f,
        "w3": raw["w3_t"].astype(jnp.bfloat16), "b3": raw["b3"],
    }


def _choose_batch_tile(B, tile_b):
    """Batch tile: multiple of 8 sublanes; for larger batches a multiple of 256
    (v6e/v7x MXU passes), capped at `tile_b`, and sized so the grid has >= 2
    steps (v7x megacore sharding of the 'parallel' axis)."""
    b8 = ((B + 7) // 8) * 8
    if b8 <= 256:
        return b8                      # tiny batch: single small tile
    cap = max(256, (tile_b // 256) * 256)
    half = -(-b8 // 2)                 # ceil(b8 / 2)
    tb = ((half + 255) // 256) * 256   # round up to a multiple of 256
    return min(tb, cap)


def actor_forward(state, kparams, tile_b=2048):
    """state: (B, input_size) f32.  kparams: output of prepare_kernel_params."""
    B, in_size = state.shape
    out_size = kparams["w3"].shape[1]

    tb = _choose_batch_tile(B, tile_b)
    b_pad = ((B + tb - 1) // tb) * tb

    # Pre-cast the batch input to bf16 on the host (halves input HBM traffic).
    x = state.astype(jnp.bfloat16)
    if b_pad != B:
        x = jnp.pad(x, ((0, b_pad - B), (0, 0)))
    grid = (b_pad // tb,)

    def resident(arr):  # whole array, same block every grid step -> stays in VMEM
        return pl.BlockSpec(arr.shape, lambda i: (0,) * arr.ndim)

    args = (x,
            kparams["w1"], kparams["b1"],
            kparams["w2"], kparams["b2"],
            kparams["w3"], kparams["b3"])

    out = pl.pallas_call(
        actor_kernel,
        out_shape=jax.ShapeDtypeStruct((b_pad, out_size), jnp.float32),
        grid=grid,
        in_specs=[pl.BlockSpec((tb, in_size), lambda i: (i, 0))]
                 + [resident(a) for a in args[1:]],
        out_specs=pl.BlockSpec((tb, out_size), lambda i: (i, 0)),
        compiler_params=pltpu.CompilerParams(
            dimension_semantics=("parallel",)),
    )(*args)
    # Skip the trailing slice when the batch needed no padding.
    return out if b_pad == B else out[:B]


def actor_reference(state, raw):
    """Pure-JAX f32 reference with the original (unfolded) layers."""
    h = jnp.maximum(state @ raw["w1_t"] + raw["b1"], 0.0)
    h = h @ raw["w2_t"] + raw["b2"]
    h = jnp.maximum(h @ raw["w22_t"] + raw["b22"], 0.0)
    return jnp.tanh(h @ raw["w3_t"] + raw["b3"])


if __name__ == "__main__":
    key = jax.random.PRNGKey(0)
    k_param, k_state = jax.random.split(key)

    batch = 8
    input_size = 32
    output_size = 8

    raw = init_actor_params(k_param, input_size, output_size)
    kparams = prepare_kernel_params(raw)   # fold / bf16-cast once, reuse per call
    state = jax.random.normal(k_state, (batch, input_size), jnp.float32)

    out = jax.block_until_ready(actor_forward(state, kparams))

    ref = actor_reference(state, raw)
    # bf16 weights/activations => loosen tolerance vs. the f32 reference.
    np.testing.assert_allclose(np.asarray(out), np.asarray(ref), rtol=0, atol=2e-2)

    print("KERNEL_OK")
</pallas_src>

<mosaic_0001>
module attributes {stable_mosaic.version = 11 : i64} {
  func.func @actor_kernel(%arg0: i32, %arg1: memref<8x32xbf16, #tpu.memory_space<vmem>>, %arg2: memref<32x256xbf16, #tpu.memory_space<vmem>>, %arg3: memref<1x256xf32, #tpu.memory_space<vmem>>, %arg4: memref<256x256xbf16, #tpu.memory_space<vmem>>, %arg5: memref<1x256xf32, #tpu.memory_space<vmem>>, %arg6: memref<256x8xbf16, #tpu.memory_space<vmem>>, %arg7: memref<1x8xf32, #tpu.memory_space<vmem>>, %arg8: memref<8x8xf32, #tpu.memory_space<vmem>>) attributes {dimension_semantics = [#tpu.dimension_semantics<parallel>], iteration_bounds = array<i64: 1>, scalar_prefetch = 0 : i64, scratch_operands = 0 : i64, tpu.core_type = #tpu.core_type<tc>, window_params = [{transform_indices = @transform_0, window_bounds = array<i64: 8, 32>}, {pipeline_mode = #tpu.pipeline_mode<synchronous>, transform_indices = @transform_1, window_bounds = array<i64: 32, 256>}, {pipeline_mode = #tpu.pipeline_mode<synchronous>, transform_indices = @transform_2, window_bounds = array<i64: 1, 256>}, {pipeline_mode = #tpu.pipeline_mode<synchronous>, transform_indices = @transform_3, window_bounds = array<i64: 256, 256>}, {pipeline_mode = #tpu.pipeline_mode<synchronous>, transform_indices = @transform_4, window_bounds = array<i64: 1, 256>}, {pipeline_mode = #tpu.pipeline_mode<synchronous>, transform_indices = @transform_5, window_bounds = array<i64: 256, 8>}, {pipeline_mode = #tpu.pipeline_mode<synchronous>, transform_indices = @transform_6, window_bounds = array<i64: 1, 8>}, {transform_indices = @transform_7, window_bounds = array<i64: 8, 8>}]} {
    %c0 = arith.constant 0 : index
    %c0_0 = arith.constant 0 : index
    %0 = vector.load %arg1[%c0, %c0_0] : memref<8x32xbf16, #tpu.memory_space<vmem>>, vector<8x32xbf16>
    %c0_1 = arith.constant 0 : index
    %c0_2 = arith.constant 0 : index
    %1 = vector.load %arg2[%c0_1, %c0_2] : memref<32x256xbf16, #tpu.memory_space<vmem>>, vector<32x256xbf16>
    %cst = arith.constant dense<0.000000e+00> : vector<8x256xf32>
    %2 = tpu.matmul %0, %1, %cst {dimension_numbers = #tpu.dot_dimension_numbers<[1], [0], [0], [1], [0, 0, 1, 1], [], []>} : vector<8x32xbf16>, vector<32x256xbf16>, vector<8x256xf32> -> vector<8x256xf32>
    %c0_3 = arith.constant 0 : index
    %c0_4 = arith.constant 0 : index
    %3 = vector.load %arg3[%c0_3, %c0_4] : memref<1x256xf32, #tpu.memory_space<vmem>>, vector<1x256xf32>
    %4 = vector.broadcast %3 : vector<1x256xf32> to vector<8x256xf32>
    %5 = arith.addf %2, %4 : vector<8x256xf32>
    %cst_5 = arith.constant 0.000000e+00 : f32
    %6 = vector.broadcast %cst_5 : f32 to vector<8x256xf32>
    %7 = arith.maximumf %5, %6 : vector<8x256xf32>
    %8 = arith.truncf %7 : vector<8x256xf32> to vector<8x256xbf16>
    %c0_6 = arith.constant 0 : index
    %c0_7 = arith.constant 0 : index
    %9 = vector.load %arg4[%c0_6, %c0_7] : memref<256x256xbf16, #tpu.memory_space<vmem>>, vector<256x256xbf16>
    %cst_8 = arith.constant dense<0.000000e+00> : vector<8x256xf32>
    %10 = tpu.matmul %8, %9, %cst_8 {dimension_numbers = #tpu.dot_dimension_numbers<[1], [0], [0], [1], [0, 0, 1, 1], [], []>} : vector<8x256xbf16>, vector<256x256xbf16>, vector<8x256xf32> -> vector<8x256xf32>
    %c0_9 = arith.constant 0 : index
    %c0_10 = arith.constant 0 : index
    %11 = vector.load %arg5[%c0_9, %c0_10] : memref<1x256xf32, #tpu.memory_space<vmem>>, vector<1x256xf32>
    %12 = vector.broadcast %11 : vector<1x256xf32> to vector<8x256xf32>
    %13 = arith.addf %10, %12 : vector<8x256xf32>
    %cst_11 = arith.constant 0.000000e+00 : f32
    %14 = vector.broadcast %cst_11 : f32 to vector<8x256xf32>
    %15 = arith.maximumf %13, %14 : vector<8x256xf32>
    %16 = arith.truncf %15 : vector<8x256xf32> to vector<8x256xbf16>
    %c0_12 = arith.constant 0 : index
    %c0_13 = arith.constant 0 : index
    %17 = vector.load %arg6[%c0_12, %c0_13] : memref<256x8xbf16, #tpu.memory_space<vmem>>, vector<256x8xbf16>
    %cst_14 = arith.constant dense<0.000000e+00> : vector<8x8xf32>
    %18 = tpu.matmul %16, %17, %cst_14 {dimension_numbers = #tpu.dot_dimension_numbers<[1], [0], [0], [1], [0, 0, 1, 1], [], []>} : vector<8x256xbf16>, vector<256x8xbf16>, vector<8x8xf32> -> vector<8x8xf32>
    %c0_15 = arith.constant 0 : index
    %c0_16 = arith.constant 0 : index
    %19 = vector.load %arg7[%c0_15, %c0_16] : memref<1x8xf32, #tpu.memory_space<vmem>>, vector<1x8xf32>
    %20 = vector.broadcast %19 : vector<1x8xf32> to vector<8x8xf32>
    %21 = arith.addf %18, %20 : vector<8x8xf32>
    %22 = math.tanh %21 : vector<8x8xf32>
    %c0_17 = arith.constant 0 : index
    %c0_18 = arith.constant 0 : index
    %23 = vector.load %arg8[%c0_17, %c0_18] : memref<8x8xf32, #tpu.memory_space<vmem>>, vector<8x8xf32>
    tpu.vector_store %arg8[%c0_17, %c0_18], %22 {strides = array<i32>} : memref<8x8xf32, #tpu.memory_space<vmem>>, vector<8x8xf32>,
    return
  }
  func.func @transform_0(%arg0: i32) -> (i32, i32) {
    %c0_i32 = arith.constant 0 : i32
    %c0_i32_0 = arith.constant 0 : i32
    return %arg0, %c0_i32 : i32, i32
  }
  func.func @transform_1(%arg0: i32) -> (i32, i32) {
    %c0_i32 = arith.constant 0 : i32
    %c0_i32_0 = arith.constant 0 : i32
    %c0_i32_1 = arith.constant 0 : i32
    return %c0_i32, %c0_i32_0 : i32, i32
  }
  func.func @transform_2(%arg0: i32) -> (i32, i32) {
    %c0_i32 = arith.constant 0 : i32
    %c0_i32_0 = arith.constant 0 : i32
    %c0_i32_1 = arith.constant 0 : i32
    return %c0_i32, %c0_i32_0 : i32, i32
  }
  func.func @transform_3(%arg0: i32) -> (i32, i32) {
    %c0_i32 = arith.constant 0 : i32
    %c0_i32_0 = arith.constant 0 : i32
    %c0_i32_1 = arith.constant 0 : i32
    return %c0_i32, %c0_i32_0 : i32, i32
  }
  func.func @transform_4(%arg0: i32) -> (i32, i32) {
    %c0_i32 = arith.constant 0 : i32
    %c0_i32_0 = arith.constant 0 : i32
    %c0_i32_1 = arith.constant 0 : i32
    return %c0_i32, %c0_i32_0 : i32, i32
  }
  func.func @transform_5(%arg0: i32) -> (i32, i32) {
    %c0_i32 = arith.constant 0 : i32
    %c0_i32_0 = arith.constant 0 : i32
    %c0_i32_1 = arith.constant 0 : i32
    return %c0_i32, %c0_i32_0 : i32, i32
  }
  func.func @transform_6(%arg0: i32) -> (i32, i32) {
    %c0_i32 = arith.constant 0 : i32
    %c0_i32_0 = arith.constant 0 : i32
    %c0_i32_1 = arith.constant 0 : i32
    return %c0_i32, %c0_i32_0 : i32, i32
  }
  func.func @transform_7(%arg0: i32) -> (i32, i32) {
    %c0_i32 = arith.constant 0 : i32
    %c0_i32_0 = arith.constant 0 : i32
    return %arg0, %c0_i32 : i32, i32
  }
}

</mosaic_0001>

<bundles_post_ra>
// kernel: tpu_custom_call.1
= control target key start
LH: loop header
LB: loop body
LE: loop exit
PB: predicated region body
PF: predicated region fallthrough
CT: control target
= control target key end

     0   :  { %12 = vsyncpa [#allocation3], 0  ;;  %s890_s0 = inlined_call_operand.vmem [shape: bf16[8,32], index: 0, kind: input, shape index: {}]   ;;  %s891_s1 = inlined_call_operand.vmem [shape: bf16[32,256], index: 1, kind: input, shape index: {}]   ;;  %s892_s2 = inlined_call_operand.vmem [shape: f32[1,256], index: 2, kind: input, shape index: {}]   ;;  %s893_s3 = inlined_call_operand.hbm [shape: bf16[256,256], index: 3, kind: input, shape index: {}]   ;;  %s894_s4 = inlined_call_operand.vmem [shape: f32[1,256], index: 4, kind: input, shape index: {}]   ;;  %s895_s5 = inlined_call_operand.vmem [shape: bf16[256,8], index: 5, kind: input, shape index: {}]   ;;  %s896_s6 = inlined_call_operand.vmem [shape: f32[1,8], index: 6, kind: input, shape index: {}]   ;;  %s897_s7 = inlined_call_operand.hbm [shape: f32[8,8], index: 7, kind: output, shape index: {}]  }
   0x1   :  { %13 = vsyncpa [#allocation4], 0  ;;  %s767_s24 = smov [#allocation2]  }
   0x2   :  { %s25_s25 = sshll.u32 %s767_s24, 4  ;;  %s26_s25 = int_to_ptr.vmem [resolvable:$true] %s25_s25 }
   0x3   :  { %s731_s26 = scalar_lea.vmem %s26_s25, 4096  ;;  %p736_p1 = scmp.lt.s32.totalorder %s26_s25, %s26_s25 }
   0x4   :  { %p732_p0 = scmp.ne.s32.totalorder %s26_s25, %s731_s26  ;;  %p737_p2 = scmp.lt.s32.totalorder %s731_s26, %s731_s26 }
   0x6   :  { %p738_p3 = por %p737_p2, %p736_p1 }
   0x8   :  { %p739_p4 = pnand %p738_p3, %p732_p0 }
   0xa   :  { %742 = shalt.err (!%p739_p4)
}
   0xb   :  { %s768_s27 = smov 128   ;;  %s769_s28 = smov 8  }
   0xc   :  { %31 = dma.hbm_to_vmem [thread:$0]  %s893_s3, 4096, %s26_s25, [#allocation3], %s768_s27, %s768_s27, %s769_s28  }
   0xd   :  { %763 = dma.done.wait [#allocation3], 4096  }
   0xe   :  { %764 = vsyncadd [#allocation3], 4294963200  ;;  %v770_v0 = vmov 0   ;;  %v651_v1 = vld [vmem:[%s891_s1 + $0x14] ss:$8 sps:$4 sm:$0xff]   ;;  %vm79_vm0 = vcmask 261120   ;;  %v49_v50 = vlaneseq }
   0xf   :  { %115 = vmatprep.mubr.bf16.mxu0 %v770_v0  ;;  %v653_v2 = vld [vmem:[%s891_s1 + $0x10] ss:$8 sps:$4 sm:$0xff]   ;;  %95 = vmatprep.subr.bf16.mxu0 %v651_v1  ;;  %v654_v3 = vld [vmem:[%s891_s1 + $0x4] ss:$8 sps:$4 sm:$0xff]   ;;  %v656_v4 = vld [vmem:[%s891_s1] ss:$8 sps:$4 sm:$0xff]  }
  0x10   :  { %96 = vmatpush1.bf16.msra.mxu0 %v653_v2  ;;  %v657_v5 = vld [vmem:[#allocation2 + $0x74] ss:$8 sps:$4 sm:$0xff]   ;;  %v659_v6 = vld [vmem:[#allocation2 + $0x70] ss:$8 sps:$4 sm:$0xff]   ;;  %v660_v7 = vld [vmem:[#allocation2 + $0x64] ss:$8 sps:$4 sm:$0xff]  }
  0x11   :  { %97 = vmatprep.subr.bf16.mxu0 %v654_v3  ;;  %332 = vmatprep.subr.bf16.mxu1 %v657_v5  ;;  %v42_v8 = vld [vmem:[%s890_s0] sm:$0xf]  ;;  %v663_v10 = vld [vmem:[#allocation2 + $0x54] ss:$8 sps:$4 sm:$0xff]   ;;  %v665_v11 = vld [vmem:[#allocation2 + $0x50] ss:$8 sps:$4 sm:$0xff]  }
  0x12   :  { %333 = vmatpush1.bf16.msra.mxu1 %v659_v6  ;;  %v662_v9 = vld [vmem:[#allocation2 + $0x60] ss:$8 sps:$4 sm:$0xff]   ;;  %v666_v12 = vld [vmem:[#allocation2 + $0x44] ss:$8 sps:$4 sm:$0xff]   ;;  %v669_v14 = vld [vmem:[#allocation2 + $0x34] ss:$8 sps:$4 sm:$0xff]  }
  0x13   :  { %334 = vmatprep.subr.bf16.mxu1 %v660_v7  ;;  %v668_v13 = vld [vmem:[#allocation2 + $0x40] ss:$8 sps:$4 sm:$0xff]   ;;  %v671_v15 = vld [vmem:[#allocation2 + $0x30] ss:$8 sps:$4 sm:$0xff]   ;;  %v672_v16 = vld [vmem:[#allocation2 + $0x24] ss:$8 sps:$4 sm:$0xff]  }
  0x14   :  { %98 = vmatpush1.bf16.msra.mxu0 %v656_v4  ;;  %v674_v17 = vld [vmem:[#allocation2 + $0x20] ss:$8 sps:$4 sm:$0xff]   ;;  %v675_v18 = vld [vmem:[#allocation2 + $0x14] ss:$8 sps:$4 sm:$0xff]   ;;  %v677_v19 = vld [vmem:[#allocation2 + $0x10] ss:$8 sps:$4 sm:$0xff]  }
  0x15   :  { %v678_v20 = vld [vmem:[#allocation2 + $0x4] ss:$8 sps:$4 sm:$0xff]   ;;  %v680_v21 = vld [vmem:[#allocation2] ss:$8 sps:$4 sm:$0xff]   ;;  %v681_v22 = vld [vmem:[#allocation2 + $0xf4] ss:$8 sps:$4 sm:$0xff]  }
  0x16   :  { %335 = vmatpush1.bf16.msra.mxu1 %v662_v9  ;;  %v683_v23 = vld [vmem:[#allocation2 + $0xf0] ss:$8 sps:$4 sm:$0xff]   ;;  %v684_v24 = vld [vmem:[#allocation2 + $0xe4] ss:$8 sps:$4 sm:$0xff]   ;;  %v686_v25 = vld [vmem:[#allocation2 + $0xe0] ss:$8 sps:$4 sm:$0xff]  }
  0x17   :  { %574 = vmatmul.mubr.msk.bf16.vlgmr.msra.gmra.mxu0 %vm79_vm0, %v42_v8  ;;  %336 = vmatprep.subr.bf16.mxu1 %v663_v10  ;;  %v687_v26 = vld [vmem:[#allocation2 + $0xd4] ss:$8 sps:$4 sm:$0xff]   ;;  %v689_v27 = vld [vmem:[#allocation2 + $0xd0] ss:$8 sps:$4 sm:$0xff]   ;;  %v690_v28 = vld [vmem:[#allocation2 + $0xc4] ss:$8 sps:$4 sm:$0xff]  }
  0x18   :  { %v692_v29 = vld [vmem:[#allocation2 + $0xc0] ss:$8 sps:$4 sm:$0xff]   ;;  %v693_v30 = vld [vmem:[#allocation2 + $0xb4] ss:$8 sps:$4 sm:$0xff]   ;;  %v695_v31 = vld [vmem:[#allocation2 + $0xb0] ss:$8 sps:$4 sm:$0xff]  }
  0x19   :  { %v696_v32 = vld [vmem:[#allocation2 + $0xa4] ss:$8 sps:$4 sm:$0xff]   ;;  %v698_v33 = vld [vmem:[#allocation2 + $0xa0] ss:$8 sps:$4 sm:$0xff]   ;;  %v699_v34 = vld [vmem:[#allocation2 + $0x94] ss:$8 sps:$4 sm:$0xff]  }
  0x1a   :  { %337 = vmatpush1.bf16.msra.mxu1 %v665_v11  ;;  %v701_v35 = vld [vmem:[#allocation2 + $0x90] ss:$8 sps:$4 sm:$0xff]   ;;  %v702_v36 = vld [vmem:[#allocation2 + $0x84] ss:$8 sps:$4 sm:$0xff]   ;;  %v704_v37 = vld [vmem:[#allocation2 + $0x80] ss:$8 sps:$4 sm:$0xff]  }
  0x1b   :  { %338 = vmatprep.subr.bf16.mxu1 %v666_v12  ;;  %v705_v38 = vld [vmem:[%s895_s5 + $0x78] sm:$0xff]   ;;  %v707_v40 = vld [vmem:[%s895_s5 + $0x70] sm:$0xff]   ;;  %v709_v42 = vld [vmem:[%s895_s5 + $0x68] sm:$0xff]   ;;  %v50_v51 = vshrl.u32 %v49_v50, 7  ;;  %vm553_vm1 = vcmask 64512  }
  0x1c   :  { %v706_v39 = vld [vmem:[%s895_s5 + $0x38] sm:$0xff]   ;;  %624 = vmatprep.subr.bf16.mxu0 %v705_v38  ;;  %v708_v41 = vld [vmem:[%s895_s5 + $0x30] sm:$0xff]   ;;  %v710_v43 = vld [vmem:[%s895_s5 + $0x28] sm:$0xff]  }
  0x1d   :  { %625 = vmatpush3.bf16.msra.mxu0 %v706_v39  ;;  %v711_v44 = vld [vmem:[%s895_s5 + $0x60] sm:$0xff]   ;;  %v713_v46 = vld [vmem:[%s895_s5 + $0x58] sm:$0xff]   ;;  %v715_v48 = vld [vmem:[%s895_s5 + $0x50] sm:$0xff]   ;;  %v51_v52 = vsub.s32 0, %v50_v51  ;;  %v55_v54 = vsub.s32 1, %v50_v51 }
  0x1e   :  { %339 = vmatpush1.bf16.msra.mxu1 %v668_v13  ;;  %626 = vmatprep.subr.bf16.mxu0 %v707_v40  ;;  %v712_v45 = vld [vmem:[%s895_s5 + $0x20] sm:$0xff]   ;;  %v714_v47 = vld [vmem:[%s895_s5 + $0x18] sm:$0xff]   ;;  %v716_v49 = vld [vmem:[%s895_s5 + $0x10] sm:$0xff]  }
  0x1f   :  { %340 = vmatprep.subr.bf16.mxu1 %v669_v14  ;;  %v47_v53 = vld [vmem:[%s892_s2] sm:$0x3]  ;;  %v717_v3 = vld [vmem:[%s895_s5 + $0x48] sm:$0xff]  }
  0x20   :  { %v52_v55 = vrot.slane %v47_v53, %v51_v52  ;;  %v56_v56 = vrot.slane %v47_v53, %v55_v54  ;;  %v718_v4 = vld [vmem:[%s895_s5 + $0x8] sm:$0xff]   ;;  %v719_v5 = vld [vmem:[%s895_s5 + $0x40] sm:$0xff]  }
  0x21   :  { %627 = vmatpush3.bf16.msra.mxu0 %v708_v41  ;;  %v720_v6 = vld [vmem:[%s895_s5] sm:$0xff]  }
  0x22   :  { %341 = vmatpush1.bf16.msra.mxu1 %v671_v15  ;;  %628 = vmatprep.subr.bf16.mxu0 %v709_v42  ;;  %v160_v7 = vld [vmem:[%s894_s4] sm:$0x3]  ;;  %s771_s4 = smov [#allocation5]  }
  0x23   :  { %342 = vmatprep.subr.bf16.mxu1 %v672_v16  ;;  %v165_v8 = vrot.slane %v160_v7, %v51_v52  ;;  %v169_v9 = vrot.slane %v160_v7, %v55_v54  ;;  %s561_s25 = sshll.u32 %s771_s4, 4  ;;  %s562_s25 = int_to_ptr.vmem [resolvable:$true] %s561_s25 }
  0x24   :  { %s743_s26 = scalar_lea.vmem %s562_s25, 128  ;;  %p748_p6 = scmp.lt.s32.totalorder %s562_s25, %s562_s25 }
  0x25   :  { %629 = vmatpush3.bf16.msra.mxu0 %v710_v43  ;;  %p744_p5 = scmp.ne.s32.totalorder %s562_s25, %s743_s26  ;;  %p749_p7 = scmp.lt.s32.totalorder %s743_s26, %s743_s26 }
  0x26   :  { %343 = vmatpush1.bf16.msra.mxu1 %v674_v17  ;;  %630 = vmatprep.subr.bf16.mxu0 %v711_v44 }
  0x27   :  { %344 = vmatprep.subr.bf16.mxu1 %v675_v18  ;;  %p750_p8 = por %p749_p7, %p748_p6 }
  0x29   :  { %631 = vmatpush3.bf16.msra.mxu0 %v712_v45  ;;  %p751_p9 = pnand %p750_p8, %p744_p5 }
  0x2a   :  { %345 = vmatpush1.bf16.msra.mxu1 %v677_v19  ;;  %632 = vmatprep.subr.bf16.mxu0 %v713_v46 }
  0x2b   :  { %346 = vmatprep.subr.bf16.mxu1 %v678_v20 }
  0x2d   :  { %633 = vmatpush3.bf16.msra.mxu0 %v714_v47 }
  0x2e   :  { %347 = vmatpush1.bf16.msra.mxu1 %v680_v21  ;;  %634 = vmatprep.subr.bf16.mxu0 %v715_v48  ;;  %v607_v21 = vld [vmem:[%s896_s6] ss:$0 sm:$0xff] }
  0x2f   :  { %348 = vmatprep.subr.bf16.mxu1 %v681_v22 }
  0x31   :  { %635 = vmatpush3.bf16.msra.mxu0 %v716_v49 }
  0x32   :  { %349 = vmatpush2.bf16.msra.mxu1 %v683_v23  ;;  %636 = vmatprep.subr.bf16.mxu0 %v717_v3 }
  0x33   :  { %350 = vmatprep.subr.bf16.mxu1 %v684_v24 }
  0x35   :  { %637 = vmatpush3.bf16.msra.mxu0 %v718_v4 }
  0x36   :  { %351 = vmatpush2.bf16.msra.mxu1 %v686_v25  ;;  %638 = vmatprep.subr.bf16.mxu0 %v719_v5 }
  0x37   :  { %352 = vmatprep.subr.bf16.mxu1 %v687_v26 }
  0x39   :  { %639 = vmatpush3.bf16.msra.mxu0 %v720_v6 }
  0x3a   :  { %353 = vmatpush2.bf16.msra.mxu1 %v689_v27 }
  0x3b   :  { %354 = vmatprep.subr.bf16.mxu1 %v690_v28 }
  0x3e   :  { %355 = vmatpush2.bf16.msra.mxu1 %v692_v29 }
  0x3f   :  { %356 = vmatprep.subr.bf16.mxu1 %v693_v30 }
  0x42   :  { %357 = vmatpush2.bf16.msra.mxu1 %v695_v31 }
  0x43   :  { %358 = vmatprep.subr.bf16.mxu1 %v696_v32 }
  0x46   :  { %359 = vmatpush2.bf16.msra.mxu1 %v698_v33 }
  0x47   :  { %360 = vmatprep.subr.bf16.mxu1 %v699_v34 }
  0x4a   :  { %361 = vmatpush2.bf16.msra.mxu1 %v701_v35 }
  0x4b   :  { %362 = vmatprep.subr.bf16.mxu1 %v702_v36 }
  0x4e   :  { %363 = vmatpush2.bf16.msra.mxu1 %v704_v37 }
  0xd7   :  { %v117_v57 = vpop.f32.mrf.mxu0 }
  0xd8   :  { %v118_v58 = vadd.f32 %v117_v57, %v52_v55 }
  0xd9   :  { %v119_v59 = vpop.f32.mrf.mxu0 }
  0xda   :  { %v120_v60 = vadd.f32 %v119_v59, %v56_v56  ;;  %v124_v61 = vmax.f32 %v118_v58, 0.0 }
  0xdb   :  { %v121_v62 = vpop.f32.mrf.mxu0 }
  0xdc   :  { %v125_v63 = vmax.f32 %v120_v60, 0.0  ;;  %v126_v2 = vpack.c.bf16 %v124_v61, %v124_v61 }
  0xdd   :  { %v122_v0 = vpop.f32.mrf.mxu0 }
  0xde   :  { %v127_v1 = vpack.c.bf16 %v125_v63, %v125_v63 }
  0xe0   :  { %364 = vmatprep.mubr.bf16.mxu1 %v127_v1 }
  0xe1   :  { %365 = vmatmul.mubr.bf16.vlgmr.msra.gmra.mxu1 %v126_v2 }
 0x1a1   :  { %v366_v10 = vpop.f32.mrf.mxu1 }
 0x1a2   :  { %v367_v11 = vadd.f32 %v366_v10, %v165_v8 }
 0x1a3   :  { %v368_v12 = vpop.f32.mrf.mxu1 }
 0x1a4   :  { %v369_v13 = vadd.f32 %v368_v12, %v169_v9  ;;  %v373_v14 = vmax.f32 %v367_v11, 0.0 }
 0x1a5   :  { %v370_v15 = vpop.f32.mrf.mxu1 }
 0x1a6   :  { %v374_v16 = vmax.f32 %v369_v13, 0.0  ;;  %v375_v19 = vpack.c.bf16 %v373_v14, %v373_v14 }
 0x1a7   :  { %v371_v17 = vpop.f32.mrf.mxu1 }
 0x1a8   :  { %v376_v18 = vpack.c.bf16 %v374_v16, %v374_v16 }
 0x1aa   :  { %544 = vmatprep.mubr.bf16.mxu0 %v376_v18 }
 0x1ab   :  { %545 = vmatmul.mubr.bf16.vlgmr.msra.gmra.mxu0 %v375_v19 }
 0x26b   :  { %v640_v20 = vpop.f32.mrf.mxu0 }
 0x26d   :  { %v641_v22 = vpop.f32.mrf.mxu0 }
 0x26e   :  { %v642_v23 = vadd.f32 %v641_v22, %v640_v20 }
 0x26f   :  { %v643_v24 = vpop.f32.mrf.mxu0 }
 0x270   :  { %v547_v25 = vadd.f32 %v642_v23, %v607_v21 }
 0x271   :  { %v644_v26 = vpop.f32.mrf.mxu0 }
 0x272   :  { %721 = vtanh.f32 %v547_v25 }
 0x27f   :  { %v722_v27 = vpop.eup %721 }
 0x280   :  { %554 = vst.msk [vmem:[#allocation5] sm:$0xff] %vm553_vm1, %v722_v27 }
 0x281   :  { %754 = shalt.err (!%p751_p9)
}
 0x282   :  { %564 = dma.vmem_to_hbm [thread:$0]  %s562_s25, 128, %s897_s7, [#allocation4]  }
 0x283   :  { %765 = dma.done.wait [#allocation4], 128  }
 0x284   :  { %766 = vsyncadd [#allocation4], 4294967168 }
 0x285   :  { %568 = vsyncpa [#allocation3], 1 }
 0x286   :  { %569 = vsyncpa [#allocation4], 1 }

</bundles_post_ra>
